<compile_context>
chip_gen: v5e
topology: v5e:2x2
jax: 0.10.0
libtpu: 0.0.40
codegen_flags: <defaults>
</compile_context>

<pallas_src>
import functools
import math

import jax
import jax.numpy as jnp
from jax import lax
from jax.experimental import pallas as pl
from jax.experimental.pallas import tpu as pltpu

LANE = 128
MATMUL_DTYPE = jnp.bfloat16   # MXU operand dtype (accumulation stays f32)


def cirtic_kernel(x_ref, q_ref,
                  w_enc_ref, b_enc_ref,
                  w_dec_ref, b_dec_ref,
                  w_h1_ref, b_h1_ref,
                  w_h2_ref, b_h2_ref,
                  out_ref,
                  hsc_ref,
                  *, BB, T, Nq):
    # One batch BLOCK (BB elements) per grid step; inputs arrive pre-flattened
    # as (BB*T, S_packed) / (BB*Nq, S_box), so all big matmuls are plain 2-D.
    x = x_ref[0]                                   # (BB*T, S_packed)  bf16
    q = q_ref[0]                                   # (BB*Nq, S_box)    bf16

    # --- att_encoder ---------------------------------------------------------
    # TODO(synk): EncoderSeq definition is not provided in the source file;
    # implemented as a per-timestep linear token encoder + ReLU.
    emb = jnp.dot(x, w_enc_ref[...], preferred_element_type=jnp.float32)
    emb = jnp.maximum(emb + b_enc_ref[...], 0.0)                  # (BB*T, H) f32

    # --- att_decoder query projection ---------------------------------------
    # TODO(synk): QDecoder definition is not provided; implemented as a
    # single-head scaled dot-product attention of projected queries over emb.
    # The 1/sqrt(H) softmax scale is already folded into w_dec / b_dec.
    qh = jnp.dot(q, w_dec_ref[...], preferred_element_type=jnp.float32)
    qh = qh + b_dec_ref[...]                                      # (BB*Nq, H) f32

    # MXU operands in bf16; softmax / elementwise math stays f32.
    emb_mx = emb.astype(MATMUL_DTYPE)
    qh_mx = qh.astype(MATMUL_DTYPE)

    # --- per-batch-element attention (tiny Nq x T), statically unrolled ------
    # T is a multiple of 8 here so the static row slices stay sublane-aligned.
    for i in range(BB):
        emb_i = emb_mx[i * T:(i + 1) * T, :]                      # (T, H)
        qh_i = qh_mx[i * Nq:(i + 1) * Nq, :]                      # (Nq, H)

        # NT form: contract the shared last dim directly (no transpose of emb
        # materialized; MXU consumes the transposed-RHS form natively).
        scores = lax.dot_general(qh_i, emb_i, (((1,), (1,)), ((), ())),
                                 preferred_element_type=jnp.float32)  # (Nq, T)

        # Row-wise, max-stabilized softmax; denominator via EUP reciprocal.
        m = jnp.max(scores, axis=-1, keepdims=True)
        p = jnp.exp(scores - m)
        denom = jnp.sum(p, axis=-1, keepdims=True)
        attn = p * pl.reciprocal(denom, approx=True)              # (Nq, T)

        # Fold h.mean(dim=1) into the attention:
        # mean_q(attn @ emb) == (mean_q attn) @ emb.
        attn_mean = jnp.mean(attn, axis=0, keepdims=True)         # (1, T)
        h_i = jnp.dot(attn_mean.astype(MATMUL_DTYPE), emb_i,
                      preferred_element_type=jnp.float32)         # (1, H)
        hsc_ref[pl.ds(i, 1), :] = h_i

    # --- head: Linear -> ReLU -> Linear, batched over the block --------------
    h = hsc_ref[...]                                              # (BB, H) f32
    hid = jnp.dot(h.astype(MATMUL_DTYPE), w_h1_ref[...],
                  preferred_element_type=jnp.float32) + b_h1_ref[...]
    hid = jnp.maximum(hid, 0.0)                                   # (BB, Hh) f32
    out = jnp.dot(hid.astype(MATMUL_DTYPE), w_h2_ref[...],
                  preferred_element_type=jnp.float32) + b_h2_ref[...]
    out_ref[0] = out.astype(out_ref.dtype)        # (BB, res_pad) lane-dense store


def _pick_bb(B, max_bb=8):
    """Batch block size: as large as reasonable (capped), but keep >= 2 grid
    steps whenever B >= 2 so both v7x TensorCores get work."""
    bb = max(1, min(max_bb, B))
    if B >= 2 and pl.cdiv(B, bb) < 2:
        bb = max(1, pl.cdiv(B, 2))
    return bb


def cirtic_forward(q, x, h_cache, params):
    B, T, S_packed = x.shape
    _, Nq, S_box = q.shape
    hidden = params['w_enc'].shape[1]
    head_hidden = params['w_h1'].shape[1]
    res_size = params['w_h2'].shape[1]

    # ---- batch blocking ------------------------------------------------------
    BB = _pick_bb(B)
    G = pl.cdiv(B, BB)
    Bp = G * BB
    if Bp != B:
        x = jnp.pad(x, ((0, Bp - B), (0, 0), (0, 0)))
        q = jnp.pad(q, ((0, Bp - B), (0, 0), (0, 0)))

    # Stack batch blocks for the projection matmuls (reshape in the wrapper so
    # no in-kernel reshape is needed); MXU operands cast to bf16.
    x_mx = x.astype(MATMUL_DTYPE).reshape(G, BB * T, S_packed)
    q_mx = q.astype(MATMUL_DTYPE).reshape(G, BB * Nq, S_box)

    # Fold the 1/sqrt(H) attention scale into the query projection.
    scale = 1.0 / math.sqrt(hidden)
    w_dec_s = (params['w_dec'] * scale).astype(MATMUL_DTYPE)
    b_dec_s = (params['b_dec'] * scale).astype(jnp.float32)

    w_enc = params['w_enc'].astype(MATMUL_DTYPE)
    b_enc = params['b_enc'].astype(jnp.float32)
    w_h1 = params['w_h1'].astype(MATMUL_DTYPE)
    b_h1 = params['b_h1'].astype(jnp.float32)

    # Lane-dense output: pad the last head layer to a multiple of 128 columns
    # so the final matmul + store are full-lane; slice real columns afterwards.
    res_pad = max(LANE, ((res_size + LANE - 1) // LANE) * LANE)
    w_h2_p = jnp.pad(params['w_h2'].astype(jnp.float32),
                     ((0, 0), (0, res_pad - res_size))).astype(MATMUL_DTYPE)
    b_h2_p = jnp.pad(params['b_h2'].astype(jnp.float32),
                     ((0, 0), (0, res_pad - res_size)))

    const = lambda g: (0, 0)   # weights/biases: resident across the batch grid

    kernel = functools.partial(cirtic_kernel, BB=BB, T=T, Nq=Nq)

    out_padded = pl.pallas_call(
        kernel,
        out_shape=jax.ShapeDtypeStruct((G, BB, res_pad), jnp.float32),
        grid_spec=pltpu.PrefetchScalarGridSpec(
            num_scalar_prefetch=0,
            grid=(G,),
            in_specs=[
                pl.BlockSpec((1, BB * T, S_packed), lambda g: (g, 0, 0)),
                pl.BlockSpec((1, BB * Nq, S_box), lambda g: (g, 0, 0)),
                pl.BlockSpec((S_packed, hidden), const),
                pl.BlockSpec((1, hidden), const),
                pl.BlockSpec((S_box, hidden), const),
                pl.BlockSpec((1, hidden), const),
                pl.BlockSpec((hidden, head_hidden), const),
                pl.BlockSpec((1, head_hidden), const),
                pl.BlockSpec((head_hidden, res_pad), const),
                pl.BlockSpec((1, res_pad), const),
            ],
            out_specs=pl.BlockSpec((1, BB, res_pad), lambda g: (g, 0, 0)),
            scratch_shapes=[pltpu.VMEM((BB, hidden), jnp.float32)],
        ),
        compiler_params=pltpu.CompilerParams(
            dimension_semantics=("parallel",)),   # megacore batch-block split
    )(x_mx, q_mx,
      w_enc, b_enc,
      w_dec_s, b_dec_s,
      w_h1, b_h1,
      w_h2_p, b_h2_p)

    out = out_padded.reshape(Bp, res_pad)[:B, :res_size]
    # TODO(synk): recurrent h_cache update depends on EncoderSeq internals
    # (not available); passed through unchanged.
    return out, h_cache


def cirtic_reference(q, x, params):
    """Pure-JAX f32 reference matching the kernel semantics."""
    emb = jnp.maximum(
        jnp.einsum('bts,sh->bth', x, params['w_enc']) + params['b_enc'], 0.0)
    qh = jnp.einsum('bqs,sh->bqh', q, params['w_dec']) + params['b_dec']
    scale = 1.0 / math.sqrt(qh.shape[-1])
    scores = jnp.einsum('bqh,bth->bqt', qh, emb) * scale
    attn = jax.nn.softmax(scores, axis=-1)
    h = jnp.einsum('bqt,bth->bqh', attn, emb)
    h_mean = jnp.mean(h, axis=1)
    hid = jnp.maximum(h_mean @ params['w_h1'] + params['b_h1'], 0.0)
    return hid @ params['w_h2'] + params['b_h2']


def init_params(key, packed_state_size, box_state_size,
                hidden_size, head_hidden_size, res_size):
    if packed_state_size == 6:
        log_alpha = jnp.array([-2.0, -2.0, -2.0, -2.0], jnp.float32)
    elif packed_state_size == 4:
        log_alpha = jnp.array([-2.0, -2.0, -2.0], jnp.float32)
    else:
        raise ValueError('Invalided problem type')
    ks = jax.random.split(key, 4)
    s = 0.1
    return {
        'w_enc': s * jax.random.normal(ks[0], (packed_state_size, hidden_size), jnp.float32),
        'b_enc': jnp.zeros((1, hidden_size), jnp.float32),
        'w_dec': s * jax.random.normal(ks[1], (box_state_size, hidden_size), jnp.float32),
        'b_dec': jnp.zeros((1, hidden_size), jnp.float32),
        'w_h1':  s * jax.random.normal(ks[2], (hidden_size, head_hidden_size), jnp.float32),
        'b_h1':  jnp.zeros((1, head_hidden_size), jnp.float32),
        'w_h2':  s * jax.random.normal(ks[3], (head_hidden_size, res_size), jnp.float32),
        'b_h2':  jnp.zeros((1, res_size), jnp.float32),
        # log_alpha is a trainable parameter in __init__ but unused in forward.
        'log_alpha': log_alpha,
    }


if __name__ == "__main__":
    # Small shapes consistent with the module's forward.
    B, T, Nq = 2, 8, 4
    packed_state_size = 4          # -> log_alpha has 3 entries
    box_state_size = 6
    hidden_size = 32
    head_hidden_size = 32
    res_size = 1

    key = jax.random.PRNGKey(0)
    k_q, k_x, k_c, k_p = jax.random.split(key, 4)

    q = jax.random.normal(k_q, (B, Nq, box_state_size), jnp.float32)
    x = jax.random.normal(k_x, (B, T, packed_state_size), jnp.float32)
    h_cache = jax.random.normal(k_c, (B, hidden_size), jnp.float32)

    params = init_params(k_p, packed_state_size, box_state_size,
                         hidden_size, head_hidden_size, res_size)

    out, h_cache_out = cirtic_forward(q, x, h_cache, params)
    jax.block_until_ready((out, h_cache_out))
    assert out.shape == (B, res_size)
    assert h_cache_out.shape == h_cache.shape

    ref = cirtic_reference(q, x, params)
    # bf16 MXU operands + approximate softmax reciprocal -> loose-but-meaningful
    # tolerance against the f32 reference.
    assert jnp.allclose(out, ref, rtol=5e-2, atol=5e-3), (out, ref)
    print("KERNEL_OK")
</pallas_src>

<mosaic_0001>
module attributes {stable_mosaic.version = 11 : i64} {
  func.func @cirtic_kernel(%arg0: i32, %arg1: memref<1x8x4xbf16, #tpu.memory_space<vmem>>, %arg2: memref<1x4x6xbf16, #tpu.memory_space<vmem>>, %arg3: memref<4x32xbf16, #tpu.memory_space<vmem>>, %arg4: memref<1x32xf32, #tpu.memory_space<vmem>>, %arg5: memref<6x32xbf16, #tpu.memory_space<vmem>>, %arg6: memref<1x32xf32, #tpu.memory_space<vmem>>, %arg7: memref<32x32xbf16, #tpu.memory_space<vmem>>, %arg8: memref<1x32xf32, #tpu.memory_space<vmem>>, %arg9: memref<32x128xbf16, #tpu.memory_space<vmem>>, %arg10: memref<1x128xf32, #tpu.memory_space<vmem>>, %arg11: memref<1x1x128xf32, #tpu.memory_space<vmem>>, %arg12: memref<1x32xf32, #tpu.memory_space<vmem>>) attributes {dimension_semantics = [#tpu.dimension_semantics<parallel>], iteration_bounds = array<i64: 2>, scalar_prefetch = 0 : i64, scratch_operands = 1 : i64, tpu.core_type = #tpu.core_type<tc>, window_params = [{transform_indices = @transform_0, window_bounds = array<i64: 1, 8, 4>}, {transform_indices = @transform_1, window_bounds = array<i64: 1, 4, 6>}, {pipeline_mode = #tpu.pipeline_mode<synchronous>, transform_indices = @transform_2, window_bounds = array<i64: 4, 32>}, {pipeline_mode = #tpu.pipeline_mode<synchronous>, transform_indices = @transform_3, window_bounds = array<i64: 1, 32>}, {pipeline_mode = #tpu.pipeline_mode<synchronous>, transform_indices = @transform_4, window_bounds = array<i64: 6, 32>}, {pipeline_mode = #tpu.pipeline_mode<synchronous>, transform_indices = @transform_5, window_bounds = array<i64: 1, 32>}, {pipeline_mode = #tpu.pipeline_mode<synchronous>, transform_indices = @transform_6, window_bounds = array<i64: 32, 32>}, {pipeline_mode = #tpu.pipeline_mode<synchronous>, transform_indices = @transform_7, window_bounds = array<i64: 1, 32>}, {pipeline_mode = #tpu.pipeline_mode<synchronous>, transform_indices = @transform_8, window_bounds = array<i64: 32, 128>}, {pipeline_mode = #tpu.pipeline_mode<synchronous>, transform_indices = @transform_9, window_bounds = array<i64: 1, 128>}, {transform_indices = @transform_10, window_bounds = array<i64: 1, 1, 128>}]} {
    %c0 = arith.constant 0 : index
    %c0_0 = arith.constant 0 : index
    %c0_1 = arith.constant 0 : index
    %0 = vector.load %arg1[%c0, %c0_0, %c0_1] : memref<1x8x4xbf16, #tpu.memory_space<vmem>>, vector<1x8x4xbf16>
    %1 = vector.shape_cast %0 : vector<1x8x4xbf16> to vector<8x4xbf16>
    %c0_2 = arith.constant 0 : index
    %c0_3 = arith.constant 0 : index
    %c0_4 = arith.constant 0 : index
    %2 = vector.load %arg2[%c0_2, %c0_3, %c0_4] : memref<1x4x6xbf16, #tpu.memory_space<vmem>>, vector<1x4x6xbf16>
    %3 = vector.shape_cast %2 : vector<1x4x6xbf16> to vector<4x6xbf16>
    %c0_5 = arith.constant 0 : index
    %c0_6 = arith.constant 0 : index
    %4 = vector.load %arg3[%c0_5, %c0_6] : memref<4x32xbf16, #tpu.memory_space<vmem>>, vector<4x32xbf16>
    %cst = arith.constant dense<0.000000e+00> : vector<8x32xf32>
    %5 = tpu.matmul %1, %4, %cst {dimension_numbers = #tpu.dot_dimension_numbers<[1], [0], [0], [1], [0, 0, 1, 1], [], []>} : vector<8x4xbf16>, vector<4x32xbf16>, vector<8x32xf32> -> vector<8x32xf32>
    %c0_7 = arith.constant 0 : index
    %c0_8 = arith.constant 0 : index
    %6 = vector.load %arg4[%c0_7, %c0_8] : memref<1x32xf32, #tpu.memory_space<vmem>>, vector<1x32xf32>
    %7 = vector.broadcast %6 : vector<1x32xf32> to vector<8x32xf32>
    %8 = arith.addf %5, %7 : vector<8x32xf32>
    %cst_9 = arith.constant 0.000000e+00 : f32
    %9 = vector.broadcast %cst_9 : f32 to vector<8x32xf32>
    %10 = arith.maximumf %8, %9 : vector<8x32xf32>
    %c0_10 = arith.constant 0 : index
    %c0_11 = arith.constant 0 : index
    %11 = vector.load %arg5[%c0_10, %c0_11] : memref<6x32xbf16, #tpu.memory_space<vmem>>, vector<6x32xbf16>
    %cst_12 = arith.constant dense<0.000000e+00> : vector<4x32xf32>
    %12 = tpu.matmul %3, %11, %cst_12 {dimension_numbers = #tpu.dot_dimension_numbers<[1], [0], [0], [1], [0, 0, 1, 1], [], []>} : vector<4x6xbf16>, vector<6x32xbf16>, vector<4x32xf32> -> vector<4x32xf32>
    %c0_13 = arith.constant 0 : index
    %c0_14 = arith.constant 0 : index
    %13 = vector.load %arg6[%c0_13, %c0_14] : memref<1x32xf32, #tpu.memory_space<vmem>>, vector<1x32xf32>
    %14 = vector.broadcast %13 : vector<1x32xf32> to vector<4x32xf32>
    %15 = arith.addf %12, %14 : vector<4x32xf32>
    %16 = arith.truncf %10 : vector<8x32xf32> to vector<8x32xbf16>
    %17 = arith.truncf %15 : vector<4x32xf32> to vector<4x32xbf16>
    %cst_15 = arith.constant dense<0.000000e+00> : vector<4x8xf32>
    %18 = tpu.matmul %17, %16, %cst_15 {dimension_numbers = #tpu.dot_dimension_numbers<[1], [1], [0], [0], [0, 0, 1, 0], [], []>} : vector<4x32xbf16>, vector<8x32xbf16>, vector<4x8xf32> -> vector<4x8xf32>
    %cst_16 = arith.constant dense<0xFF800000> : vector<4xf32>
    %19 = vector.multi_reduction <maximumf>, %18, %cst_16 [1] : vector<4x8xf32> to vector<4xf32>
    %20 = vector.shape_cast %19 : vector<4xf32> to vector<4x1xf32>
    %21 = vector.broadcast %20 : vector<4x1xf32> to vector<4x8xf32>
    %22 = arith.subf %18, %21 : vector<4x8xf32>
    %23 = math.exp %22 : vector<4x8xf32>
    %cst_17 = arith.constant dense<0.000000e+00> : vector<4xf32>
    %24 = vector.multi_reduction <add>, %23, %cst_17 [1] : vector<4x8xf32> to vector<4xf32>
    %25 = vector.shape_cast %24 : vector<4xf32> to vector<4x1xf32>
    %26 = tpu.reciprocal %25 {approx = true} : vector<4x1xf32> -> vector<4x1xf32>
    %27 = vector.broadcast %26 : vector<4x1xf32> to vector<4x8xf32>
    %28 = arith.mulf %23, %27 : vector<4x8xf32>
    %cst_18 = arith.constant dense<0.000000e+00> : vector<8xf32>
    %29 = vector.multi_reduction <add>, %28, %cst_18 [0] : vector<4x8xf32> to vector<8xf32>
    %30 = vector.shape_cast %29 : vector<8xf32> to vector<1x8xf32>
    %cst_19 = arith.constant 4.000000e+00 : f32
    %31 = vector.broadcast %cst_19 : f32 to vector<1x8xf32>
    %32 = arith.divf %30, %31 : vector<1x8xf32>
    %33 = arith.truncf %32 : vector<1x8xf32> to vector<1x8xbf16>
    %cst_20 = arith.constant dense<0.000000e+00> : vector<1x32xf32>
    %34 = tpu.matmul %33, %16, %cst_20 {dimension_numbers = #tpu.dot_dimension_numbers<[1], [0], [0], [1], [0, 0, 1, 1], [], []>} : vector<1x8xbf16>, vector<8x32xbf16>, vector<1x32xf32> -> vector<1x32xf32>
    %c0_21 = arith.constant 0 : index
    %c0_22 = arith.constant 0 : index
    %35 = vector.load %arg12[%c0_21, %c0_22] : memref<1x32xf32, #tpu.memory_space<vmem>>, vector<1x32xf32>
    tpu.vector_store %arg12[%c0_21, %c0_22], %34 {strides = array<i32>} : memref<1x32xf32, #tpu.memory_space<vmem>>, vector<1x32xf32>,
    %c0_23 = arith.constant 0 : index
    %c0_24 = arith.constant 0 : index
    %36 = vector.load %arg12[%c0_23, %c0_24] : memref<1x32xf32, #tpu.memory_space<vmem>>, vector<1x32xf32>
    %37 = arith.truncf %36 : vector<1x32xf32> to vector<1x32xbf16>
    %c0_25 = arith.constant 0 : index
    %c0_26 = arith.constant 0 : index
    %38 = vector.load %arg7[%c0_25, %c0_26] : memref<32x32xbf16, #tpu.memory_space<vmem>>, vector<32x32xbf16>
    %cst_27 = arith.constant dense<0.000000e+00> : vector<1x32xf32>
    %39 = tpu.matmul %37, %38, %cst_27 {dimension_numbers = #tpu.dot_dimension_numbers<[1], [0], [0], [1], [0, 0, 1, 1], [], []>} : vector<1x32xbf16>, vector<32x32xbf16>, vector<1x32xf32> -> vector<1x32xf32>
    %c0_28 = arith.constant 0 : index
    %c0_29 = arith.constant 0 : index
    %40 = vector.load %arg8[%c0_28, %c0_29] : memref<1x32xf32, #tpu.memory_space<vmem>>, vector<1x32xf32>
    %41 = arith.addf %39, %40 : vector<1x32xf32>
    %cst_30 = arith.constant 0.000000e+00 : f32
    %42 = vector.broadcast %cst_30 : f32 to vector<1x32xf32>
    %43 = arith.maximumf %41, %42 : vector<1x32xf32>
    %44 = arith.truncf %43 : vector<1x32xf32> to vector<1x32xbf16>
    %c0_31 = arith.constant 0 : index
    %c0_32 = arith.constant 0 : index
    %45 = vector.load %arg9[%c0_31, %c0_32] : memref<32x128xbf16, #tpu.memory_space<vmem>>, vector<32x128xbf16>
    %cst_33 = arith.constant dense<0.000000e+00> : vector<1x128xf32>
    %46 = tpu.matmul %44, %45, %cst_33 {dimension_numbers = #tpu.dot_dimension_numbers<[1], [0], [0], [1], [0, 0, 1, 1], [], []>} : vector<1x32xbf16>, vector<32x128xbf16>, vector<1x128xf32> -> vector<1x128xf32>
    %c0_34 = arith.constant 0 : index
    %c0_35 = arith.constant 0 : index
    %47 = vector.load %arg10[%c0_34, %c0_35] : memref<1x128xf32, #tpu.memory_space<vmem>>, vector<1x128xf32>
    %48 = arith.addf %46, %47 : vector<1x128xf32>
    %c0_36 = arith.constant 0 : index
    %c0_37 = arith.constant 0 : index
    %c0_38 = arith.constant 0 : index
    %49 = vector.load %arg11[%c0_36, %c0_37, %c0_38] : memref<1x1x128xf32, #tpu.memory_space<vmem>>, vector<1x1x128xf32>
    %50 = vector.shape_cast %49 : vector<1x1x128xf32> to vector<1x128xf32>
    %51 = vector.shape_cast %48 : vector<1x128xf32> to vector<1x1x128xf32>
    tpu.vector_store %arg11[%c0_36, %c0_37, %c0_38], %51 {strides = array<i32>} : memref<1x1x128xf32, #tpu.memory_space<vmem>>, vector<1x1x128xf32>,
    return
  }
  func.func @transform_0(%arg0: i32) -> (i32, i32, i32) {
    %c0_i32 = arith.constant 0 : i32
    %c0_i32_0 = arith.constant 0 : i32
    %c0_i32_1 = arith.constant 0 : i32
    return %arg0, %c0_i32, %c0_i32_0 : i32, i32, i32
  }
  func.func @transform_1(%arg0: i32) -> (i32, i32, i32) {
    %c0_i32 = arith.constant 0 : i32
    %c0_i32_0 = arith.constant 0 : i32
    %c0_i32_1 = arith.constant 0 : i32
    return %arg0, %c0_i32, %c0_i32_0 : i32, i32, i32
  }
  func.func @transform_2(%arg0: i32) -> (i32, i32) {
    %c0_i32 = arith.constant 0 : i32
    %c0_i32_0 = arith.constant 0 : i32
    %c0_i32_1 = arith.constant 0 : i32
    return %c0_i32, %c0_i32_0 : i32, i32
  }
  func.func @transform_3(%arg0: i32) -> (i32, i32) {
    %c0_i32 = arith.constant 0 : i32
    %c0_i32_0 = arith.constant 0 : i32
    %c0_i32_1 = arith.constant 0 : i32
    return %c0_i32, %c0_i32_0 : i32, i32
  }
  func.func @transform_4(%arg0: i32) -> (i32, i32) {
    %c0_i32 = arith.constant 0 : i32
    %c0_i32_0 = arith.constant 0 : i32
    %c0_i32_1 = arith.constant 0 : i32
    return %c0_i32, %c0_i32_0 : i32, i32
  }
  func.func @transform_5(%arg0: i32) -> (i32, i32) {
    %c0_i32 = arith.constant 0 : i32
    %c0_i32_0 = arith.constant 0 : i32
    %c0_i32_1 = arith.constant 0 : i32
    return %c0_i32, %c0_i32_0 : i32, i32
  }
  func.func @transform_6(%arg0: i32) -> (i32, i32) {
    %c0_i32 = arith.constant 0 : i32
    %c0_i32_0 = arith.constant 0 : i32
    %c0_i32_1 = arith.constant 0 : i32
    return %c0_i32, %c0_i32_0 : i32, i32
  }
  func.func @transform_7(%arg0: i32) -> (i32, i32) {
    %c0_i32 = arith.constant 0 : i32
    %c0_i32_0 = arith.constant 0 : i32
    %c0_i32_1 = arith.constant 0 : i32
    return %c0_i32, %c0_i32_0 : i32, i32
  }
  func.func @transform_8(%arg0: i32) -> (i32, i32) {
    %c0_i32 = arith.constant 0 : i32
    %c0_i32_0 = arith.constant 0 : i32
    %c0_i32_1 = arith.constant 0 : i32
    return %c0_i32, %c0_i32_0 : i32, i32
  }
  func.func @transform_9(%arg0: i32) -> (i32, i32) {
    %c0_i32 = arith.constant 0 : i32
    %c0_i32_0 = arith.constant 0 : i32
    %c0_i32_1 = arith.constant 0 : i32
    return %c0_i32, %c0_i32_0 : i32, i32
  }
  func.func @transform_10(%arg0: i32) -> (i32, i32, i32) {
    %c0_i32 = arith.constant 0 : i32
    %c0_i32_0 = arith.constant 0 : i32
    %c0_i32_1 = arith.constant 0 : i32
    return %arg0, %c0_i32, %c0_i32_0 : i32, i32, i32
  }
}

</mosaic_0001>

<bundles_post_ra>
// kernel: tpu_custom_call.1
= control target key start
LH: loop header
LB: loop body
LE: loop exit
PB: predicated region body
PF: predicated region fallthrough
CT: control target
= control target key end

     0   :  { %s1406_s0 = inlined_call_operand.vmem [shape: bf16[2,8,4], index: 0, kind: input, shape index: {}]   ;;  %s1407_s1 = inlined_call_operand.hbm [shape: bf16[2,4,6], index: 1, kind: input, shape index: {}]   ;;  %s1408_s2 = inlined_call_operand.hbm [shape: bf16[4,32], index: 2, kind: input, shape index: {}]   ;;  %s1409_s3 = inlined_call_operand.vmem [shape: f32[1,32], index: 3, kind: input, shape index: {}]   ;;  %s1410_s4 = inlined_call_operand.hbm [shape: bf16[6,32], index: 4, kind: input, shape index: {}]   ;;  %s1411_s5 = inlined_call_operand.hbm [shape: f32[1,32], index: 5, kind: input, shape index: {}]   ;;  %s1412_s6 = inlined_call_operand.vmem [shape: bf16[32,32], index: 6, kind: input, shape index: {}]   ;;  %s1413_s7 = inlined_call_operand.vmem [shape: f32[1,32], index: 7, kind: input, shape index: {}]   ;;  %s1414_s8 = inlined_call_operand.hbm [shape: bf16[32,128], index: 8, kind: input, shape index: {}]   ;;  %s1415_s9 = inlined_call_operand.vmem [shape: f32[1,128], index: 9, kind: input, shape index: {}]   ;;  %s1416_s10 = inlined_call_operand.hbm [shape: f32[2,1,128], index: 10, kind: output, shape index: {}]  }
   0x1   :  { %1417 = sst [smem:[#allocation18_spill]] %s1408_s2 }
   0x2   :  { %1418 = sst [smem:[#allocation19_spill]] %s1410_s4 }
   0x3   :  { %1419 = sst [smem:[#allocation20_spill]] %s1411_s5 }
   0x4   :  { %1420 = sst [smem:[#allocation21_spill]] %s1414_s8 }
   0x5   :  { %15 = vsyncpa [#allocation4], 0 }
   0x6   :  { %17 = vsyncpa [#allocation4 + $0x1], 0 }
   0x7   :  { %18 = vsyncpa [#allocation7], 0 }
   0x8   :  { %19 = vsyncpa [#allocation10], 0 }
   0x9   :  { %20 = vsyncpa [#allocation5], 0 }
   0xa   :  { %22 = vsyncpa [#allocation5 + $0x1], 0  ;;  %s1211_s13 = smov 0   ;;  %s1213_s14 = smov 0  }
   0xb   :  { %s1215_s15 = smov 0   ;;  %s1217_s16 = smov 0  }
   0xc LB: > { %s1421_s2 = sld [smem:[#allocation18_spill]]  ;;  %s1235_s20 = sadd.s32 4294967295, %s1147_s16   ;;  %s1147_s16 = sphi %s1217_s16, %s1438_s16   ;;  %s1143_s15 = sphi %s1215_s15, %s1437_s15   ;;  %s1139_s14 = sphi %s1213_s14, %s1436_s14   ;;  %s1135_s13 = sphi %s1211_s13, %s1435_s13  }
   0xd   : > { %p782_p0 = scmp.ge.s32.totalorder %s1147_s16, 1  ;;  %p75_p1 = scmp.eq.s32.totalorder %s1235_s20, 0 }
   0xe   : > { %p279_p2 = scmp.lt.s32.totalorder %s1147_s16, 3  ;;  %s1149_s22 = smov [#allocation6]  }
   0xf   : > { %s293_s23 = sshll.u32 %s1149_s22, 4  ;;  %s1423_s5 = sld [smem:[#allocation20_spill]]  ;;  %s294_s23 = int_to_ptr.vmem [resolvable:$true] %s293_s23 }
  0x10   : > { %p1240_p3 = pnand %p782_p0, %p279_p2  ;;  %s1150_s28 = smov [#allocation9]  }
  0x11   : > { %s320_s29 = sshll.u32 %s1150_s28, 4  ;;  %s1425_s4 = sld [smem:[#allocation19_spill]]  ;;  %s321_s29 = int_to_ptr.vmem [resolvable:$true] %s320_s29 }
  0x12   : > { %s291_s19 = sshll.u32 %s1421_s2, 4  ;;  %p845_p5 = pneg %p1240_p3  ;;  %s292_s19 = int_to_ptr.hbm [resolvable:$true] %s291_s19 }
  0x13   : > { %s1426_s8 = sld [smem:[#allocation21_spill]]  ;;  %s1151_s24 = smov [#allocation8]  }
  0x14   : > { %p1252_p6 = pnand %p845_p5, %p75_p1  ;;  %s308_s25 = sshll.u32 %s1151_s24, 4  ;;  %s309_s25 = int_to_ptr.vmem [resolvable:$true] %s308_s25 }
  0x15   : > { %s318_s26 = sshll.u32 %s1423_s5, 4  ;;  %s1154_s28 = smov 4   ;;  %s319_s26 = int_to_ptr.hbm [resolvable:$true] %s318_s26 }
  0x16   : > { %848 = dma.hbm_to_vmem [thread:$0]  (!%p1252_p6), %s292_s19, 32, %s294_s23, [#allocation7]  }
  0x17   : > { %s306_s12 = sshll.u32 %s1425_s4, 4  ;;  %s1152_s19 = smov [#allocation11]   ;;  %s307_s12 = int_to_ptr.hbm [resolvable:$true] %s306_s12 }
  0x18   : > { %854 = dma.hbm_to_vmem [thread:$0]  (!%p1252_p6), %s319_s26, 16, %s321_s29, [#allocation10]  }
  0x19   : > { %s335_s22 = sshll.u32 %s1426_s8, 4  ;;  %s337_s23 = sshll.u32 %s1152_s19, 4  ;;  %s336_s22 = int_to_ptr.hbm [resolvable:$true] %s335_s22  ;;  %s338_s23 = int_to_ptr.vmem [resolvable:$true] %s337_s23 }
  0x1a   : > { %851 = dma.hbm_to_vmem [thread:$0]  (!%p1252_p6), %s307_s12, 64, %s309_s25, [#allocation7]  }
  0x1b   : > { %s1153_s26 = smov 64   ;;  %s781_s29 = sadd.s32 4294967294, %s1147_s16  }
  0x1c   : > { %857 = dma.hbm_to_vmem [thread:$0]  (!%p1252_p6), %s336_s22, 256, %s338_s23, [#allocation10], %s1153_s26, %s1153_s26, %s1154_s28  }
  0x1d   : > { %s1272_s30 = sadd.s32 1, %s1147_s16   ;;  %s61_s17 = sadd.s32 1, %s1143_s15 }
  0x1e   : > { %s58_s11 = ssub.s32 %s1147_s16, %s1272_s30  ;;  %p68_p8 = scmp.ne.s32.totalorder %s1143_s15, %s1139_s14 }
  0x1f   : > { %p59_p7 = scmp.eq.s32.totalorder %s58_s11, 0  ;;  %p69_p9 = scmp.eq.s32.totalorder %s1147_s16, 0 }
  0x20   : > { %p74_p10 = scmp.ne.s32.totalorder %s1139_s14, %s1135_s13  ;;  %p266_p13 = scmp.eq.s32.totalorder %s1235_s20, 1 }
  0x21   : > { %s1283_s12 = scalar_select %p59_p7, %s1143_s15, %s61_s17  }
  0x22   : > { %p1285_p11 = por %p69_p9, %p68_p8  ;;  %p1291_p12 = por %p75_p1, %p74_p10 }
  0x23   : > { %1427 = sst [smem:[#allocation17_spill]] %s1283_s12  ;;  %p272_p0 = scmp.eq.s32.totalorder %s781_s29, 1 }
  0x24   : > { %p870_p2 = scmp.lt.s32.totalorder %s1147_s16, 2  ;;  %s361_s22 = sand.u32 1, %s1143_s15  }
  0x25   : > { %p1298_p5 = por %p266_p13, %p68_p8  ;;  %p1302_p6 = por %p272_p0, %p74_p10 }
  0x26   : > { %s788_s19 = sshll.u32 %s361_s22, 1  ;;  %s789_s23 = sshll.u32 %s1147_s16, 1 }
  0x27   : > { %s369_s11 = scalar_lea.hbm %s1407_s1, %s789_s23  ;;  %s365_s17 = scalar_lea.vmem [#allocation3], %s788_s19 }
  0x28   : > { %s373_s2 = sshll.u32 %s365_s17, 4  ;;  %s371_s4 = sshll.u32 %s369_s11, 4  ;;  %s374_s2 = int_to_ptr.vmem [resolvable:$true] %s373_s2  ;;  %s372_s4 = int_to_ptr.hbm [resolvable:$true] %s371_s4 }
  0x29   : > { %p1312_p7 = pnand %p870_p2, %p1285_p11  ;;  %s362_s5 = scalar_lea.sflag [#allocation4], %s361_s22 }
  0x2a   : > { %s1043_s8 = sshra.s32 %s372_s4, 4  ;;  %s1050_s26 = scalar_lea.hbm %s1407_s1, 4  ;;  %s1044_s8 = int_to_ptr.hbm [resolvable:$true] %s1043_s8 }
  0x2b   : > { %s1045_s12 = scalar_lea.hbm %s1044_s8, 2  ;;  %p1047_p9 = pneg %p1312_p7 }
  0x2c   : > { %p1046_p8 = scmp.ne.s32.totalorder %s1044_s8, %s1045_s12  ;;  %p1051_p11 = scmp.lt.s32.totalorder %s1044_s8, %s1407_s1 }
  0x2d   : > { %p1052_p0 = scmp.lt.s32.totalorder %s1050_s26, %s1045_s12 }
  0x2e   : > { %p1048_p10 = pnand %p1047_p9, %p1046_p8 }
  0x2f   : > { %p1053_p2 = por %p1052_p0, %p1051_p11 }
  0x30   : > { %p1049_p13 = pneg %p1048_p10 }
  0x32   : > { %p1054_p4 = pnand %p1053_p2, %p1049_p13 }
  0x34   : > { %1057 = shalt.err (!%p1054_p4)
}
  0x35   : > { %861 = dma.hbm_to_vmem [thread:$0]  (!%p1312_p7), %s372_s4, 32, %s374_s2, %s362_s5  }
  0x36   : > { %382 = sbr.rel (%p1240_p3) target bundleno = 1022 (0x3fe), region = 60  ;;  %s1329_s22 = sand.u32 (!%p1240_p3), 1, %s1139_s14  }
  0x37   : > { %s791_s11 = sshll.u32 (!%p1240_p3), %s1329_s22, 1  ;;  %s385_s17 = scalar_lea.sflag (!%p1240_p3), [#allocation4], %s1329_s22 }
  0x38   : > { %s388_s19 = scalar_lea.vmem (!%p1240_p3), [#allocation3], %s791_s11 }
  0x3b   : > { %1118 = dma.done.wait (%p1291_p12), %s385_s17, 32  }
  0x3c   : > { %1120 = vsyncadd (%p1291_p12), %s385_s17, 4294967264 }
  0x3d   : > { %1122 = dma.done.wait (%p75_p1), [#allocation7], 96  }
  0x3e   : > { %1124 = vsyncadd (%p75_p1), [#allocation7], 4294967200 }
  0x3f   : > { %1126 = dma.done.wait (%p75_p1), [#allocation10], 272  }
  0x40   : > { %1128 = vsyncadd (%p75_p1), [#allocation10], 4294967024  ;;  %p449_p3 = scmp.lt.s32.totalorder %s1235_s20, 1  ;;  %vm465_vm0 = vcmask 1041408   ;;  %vm492_vm1 = vcmask 1042432   ;;  %vm461_vm2 = vcmask 31744  }
  0x41   : > { %v456_v0 = vld [vmem:[#allocation6] sm:$0x3]  ;;  %v483_v1 = vld [vmem:[#allocation8] sm:$0x7]  ;;  %vm488_vm3 = vcmask 48128   ;;  %vm511_vm4 = vcmask 261120  }
  0x42   : > { %s450_s2 = scalar_select %p449_p3, %s1235_s20, 1  ;;  %v467_v2 = vsel %vm465_vm0, %v456_v0, 0  ;;  %v494_v3 = vsel %vm492_vm1, %v483_v1, 0  ;;  %v455_v5 = vld [vmem:[%s388_s19] sm:$0x3]  ;;  %vm563_vm5 = vcmask 1043456  }
  0x43   : > { %476 = vmatpush.bf16.msra.mxu0 %v467_v2  ;;  %503 = vmatpush.bf16.msra.mxu1 %v494_v3  ;;  %v915_v6 = vld [vmem:[%s1409_s3] ss:$0 sm:$0xff]  ;;  %v916_v11 = vld [vmem:[#allocation9] ss:$0 sm:$0xff]  ;;  %vm531_vm6 = vcmask 60416   ;;  %v1155_v27 = vmov 4.0  }
  0x44   : > { %s796_s4 = sshll.u32 %s450_s2, 2  ;;  %v822_v28 = vld [vmem:[%s1412_s6 + $0x8] sm:$0xff]  ;;  %vm559_vm8 = vcmask 64512   ;;  %v821_v47 = vld [vmem:[%s1412_s6] sm:$0xff]  ;;  %v824_v48 = vld [vmem:[#allocation11 + $0x8] sm:$0xff]  ;;  %vm579_vm9 = vcmask 253952   ;;  %s661_s2 = scalar_lea.hbm %s1416_s10, %s1235_s20 }
  0x45   : > { %s452_s21 = scalar_lea.vmem %s1406_s0, %s796_s4  ;;  %v823_v49 = vld [vmem:[#allocation11] sm:$0xff]  ;;  %v587_v54 = vld [vmem:[%s1413_s7] sm:$0x1]  ;;  %s448_s8 = scalar_lea.vmem [#allocation12], %s1329_s22 }
  0x46   : > { %v454_v4 = vld [vmem:[%s452_s21] sm:$0xf]  ;;  %798 = vmatmul.msk.bf16.vlgmr.msra.gmra.mxu1 %vm488_vm3, %v455_v5  ;;  %s663_s21 = sshll.u32 %s448_s8, 4  ;;  %s665_s12 = sshll.u32 %s661_s2, 4  ;;  %s664_s21 = int_to_ptr.vmem [resolvable:$true] %s663_s21  ;;  %s666_s12 = int_to_ptr.hbm [resolvable:$true] %s665_s12 }
  0x47   : > { %797 = vmatmul.msk.bf16.vlgmr.msra.gmra.mxu0 %vm461_vm2, %v454_v4  ;;  %644 = vmatpush.bf16.msrb.mxu1 %v824_v48  ;;  %v622_v60 = vld [vmem:[%s1415_s9] sm:$0x1]  ;;  %s653_s27 = scalar_lea.sflag [#allocation5], %s1329_s22  ;;  %s1087_s29 = sshra.s32 %s666_s12, 4  ;;  %s1088_s29 = int_to_ptr.hbm [resolvable:$true] %s1087_s29 }
  0x48   : > { %609 = vmatpush.bf16.msrb.mxu0 %v822_v28  ;;  %s1089_s23 = scalar_lea.hbm %s1088_s29, 1  ;;  %s1093_s28 = scalar_lea.hbm %s1416_s10, 2 }
  0x49   : > { %p1090_p1 = scmp.ne.s32.totalorder %s1088_s29, %s1089_s23  ;;  %p1094_p7 = scmp.lt.s32.totalorder %s1088_s29, %s1416_s10 }
  0x4a   : > { %p1095_p8 = scmp.lt.s32.totalorder %s1093_s28, %s1089_s23 }
  0x4b   : > { %645 = vmatpush.bf16.msrb.mxu1 %v823_v49  ;;  %p1091_p4 = pnand %p1090_p1, %p1298_p5 }
  0x4c   : > { %610 = vmatpush.bf16.msrb.mxu0 %v821_v47  ;;  %p1096_p9 = por %p1095_p8, %p1094_p7 }
  0x4d   : > { %p1092_p12 = pneg %p1091_p4 }
  0x4f   : > { %p1097_p10 = pnand %p1096_p9, %p1092_p12 }
  0xc3   : > { %v505_v8 = vpop.f32.mrf.mxu1 }
  0xc4   : > { %v478_v7 = vpop.f32.mrf.mxu0  ;;  %v506_v13 = vadd.f32 %v916_v11, %v505_v8 }
  0xc5   : > { %v479_v9 = vadd.f32 %v915_v6, %v478_v7 }
  0xc6   : > { %v510_v18 = vpack.c.bf16 %v506_v13, %v506_v13 }
  0xc7   : > { %v482_v10 = vmax.f32 %v479_v9, 0.0 }
  0xc9   : > { %v509_v12 = vpack.c.bf16 %v482_v10, %v482_v10 }
  0xcb   : > { %v516_v14 = vsel %vm511_vm4, %v509_v12, 0  ;;  %v564_v15 = vsel %vm563_vm5, %v509_v12, 0  ;;  %v507_v17 = vpop.f32.mrf.mxu1 }
  0xcc   : > { %v480_v16 = vpop.f32.mrf.mxu0  ;;  %525 = vmatpush.bf16.xpose.msra.mxu2 %v516_v14  ;;  %573 = vmatpush.bf16.msra.mxu3 %v564_v15 }
  0xd3   : > { %799 = vmatmul.msk.bf16.vlgmr.msra.gmra.mxu2 %vm511_vm4, %v510_v18 }
 0x156   : > { %v527_v19 = vpop.f32.mrf.mxu2 }
 0x157   : > { %v532_v20 = vsel %vm531_vm6, %v527_v19, -inf }
 0x158   : > { %533 = vmax.xlane.f32.xlu0 %v532_v20 }
 0x15e   : > { %v529_v21 = vpop.f32.mrf.mxu2 }
 0x1cb   : > { %v534_v22 = vpop.xlane.xlu0 %533 }
 0x1cc   : > { %v535_v23 = vsub.f32 %v527_v19, %v534_v22 }
 0x1ce   : > { %v536_v24 = vmul.f32 1.442695, %v535_v23 }
 0x1d0   : > { %917 = vpow2.f32 %v536_v24 }
 0x1d1   : > { %919 = vrcp.f32 %v1155_v27 }
 0x1d6   : > { %v918_v25 = vpop.eup %917 }
 0x1d7   : > { %v538_v26 = vsel %vm531_vm6, %v918_v25, 0.0  ;;  %v920_v30 = vpop.eup %919 }
 0x1d8   : > { %539 = vadd.xlane.f32.xlu0 %v538_v26  ;;  %v551_v31 = vmul.f32 4.0, %v920_v30  ;;  %vm555_vm7 = vweird.f32 %v920_v30 }
 0x1da   : > { %v552_v34 = vsub.f32 1.0, %v551_v31 }
 0x1dc   : > { %v553_v37 = vmul.f32 %v920_v30, %v552_v34 }
 0x1de   : > { %v554_v40 = vadd.f32 %v920_v30, %v553_v37 }
 0x1e0   : > { %v556_v43 = vsel %vm555_vm7, %v920_v30, %v554_v40 }
 0x24b   : > { %v540_v29 = vpop.xlane.xlu0 %539 }
 0x24c   : > { %921 = vrcp.f32 %v540_v29 }
 0x252   : > { %v922_v32 = vpop.eup %921 }
 0x253   : > { %v542_v33 = vmul.f32 %v922_v32, %v918_v25 }
 0x255   : > { %v543_v35 = vsel %vm531_vm6, %v542_v33, 0.0 }
 0x256   : > { %v544_v36 = vrot.slane %v543_v35, 4 }
 0x258   : > { %v545_v38 = vadd.f32 %v544_v36, %v543_v35 }
 0x25a   : > { %v546_v39 = vrot.slane %v545_v38, 2 }
 0x25c   : > { %v547_v41 = vadd.f32 %v546_v39, %v545_v38 }
 0x25e   : > { %v548_v42 = vrot.slane %v547_v41, 1 }
 0x260   : > { %v549_v44 = vadd.f32 %v548_v42, %v547_v41 }
 0x262   : > { %v557_v45 = vmul.f32 %v556_v43, %v549_v44 }
 0x264   : > { %v558_v46 = vpack.c.bf16 %v557_v45, %v557_v45 }
 0x266   : > { %800 = vmatmul.msk.bf16.vlgmr.msra.gmra.mxu3 %vm559_vm8, %v558_v46 }
 0x2e9   : > { %v575_v50 = vpop.f32.mrf.mxu3 }
 0x2ea   : > { %580 = vst.msk [vmem:[#allocation2] sm:$0x1] %vm579_vm9, %v575_v50 }
 0x2f1   : > { %v577_v51 = vpop.f32.mrf.mxu3  ;;  %v581_v52 = vld [vmem:[#allocation2] sm:$0x1] }
 0x2f2   : > { %v582_v53 = vpack.c.bf16 %v581_v52, %v581_v52 }
 0x2f4   : > { %809 = vmatmul.msk.bf16.vlgmr.msrb.gmra.mxu0 %vm511_vm4, %v582_v53 }
 0x371   : > { %v612_v55 = vpop.f32.mrf.mxu0 }
 0x372   : > { %v613_v56 = vadd.f32 %v612_v55, %v587_v54 }
 0x374   : > { %v616_v57 = vmax.f32 %v613_v56, 0.0 }
 0x376   : > { %v617_v58 = vpack.c.bf16 %v616_v57, %v616_v57 }
 0x378   : > { %818 = vmatmul.msk.bf16.vlgmr.msrb.gmra.mxu1 %vm511_vm4, %v617_v58 }
 0x379   : > { %v614_v59 = vpop.f32.mrf.mxu0 }
 0x3f5   : > { %v647_v61 = vpop.f32.mrf.mxu1 }
 0x3f6   : > { %v648_v62 = vadd.f32 %v647_v61, %v622_v60 }
 0x3f8   : > { %651 = vst [vmem:[%s448_s8] sm:$0x1] %v648_v62 }
 0x3f9   : > { %1100 = shalt.err (!%p1097_p10)
}
 0x3fa   : > { %843 = dma.vmem_to_hbm [thread:$0]  (%p1298_p5), %s664_s21, 16, %s666_s12, %s653_s27  }
 0x3fd   : > { %v649_v63 = vpop.f32.mrf.mxu1 }
 0x3fe PF: > { %s677_s22 = sand.u32 1, %s1135_s13   ;;  %p1433_p13 = scmp.ge.s32.totalorder %s1147_s16, 2 }
 0x3ff   : > { %s678_s17 = scalar_lea.sflag [#allocation5], %s677_s22 }
 0x400   : > { %p863_p11 = pnand %p1433_p13, %p1302_p6 }
 0x402   : > { %p864_p0 = pneg %p863_p11 }
 0x404   : > { %1130 = dma.done.wait (%p864_p0), %s678_s17, 16  }
 0x405   : > { %1132 = vsyncadd (%p864_p0), %s678_s17, 4294967280  ;;  %s1434_s19 = sld [smem:[#allocation17_spill]]  ;;  %p25_p2 = scmp.ge.s32.totalorder %s1272_s30, 4  }
 0x406   : > { %s1435_s13 = smov %s1139_s14  ;;  %s1436_s14 = smov %s1143_s15 }
 0x407   : > { %s1438_s16 = smov %s1272_s30  ;;  %27 = sbr.rel (!%p25_p2) target bundleno = 12 (0xc), region = 124 }
 0x40b   : > { %s1437_s15 = smov %s1434_s19 }
 0x40c   :  { %683 = vsyncpa [#allocation4], 1 }
 0x40d   :  { %685 = vsyncpa [#allocation4 + $0x1], 1 }
 0x40e   :  { %686 = vsyncpa [#allocation7], 1 }
 0x40f   :  { %687 = vsyncpa [#allocation10], 1 }
 0x410   :  { %688 = vsyncpa [#allocation5], 1 }
 0x411   :  { %690 = vsyncpa [#allocation5 + $0x1], 1 }

</bundles_post_ra>
